<compile_context>
chip_gen: v7x
topology: tpu7x:2x2x1
jax: 0.10.0
libtpu: 0.0.40
codegen_flags: <defaults>
</compile_context>

<pallas_src>
import functools
import math

import jax
import jax.numpy as jnp
from jax.experimental import pallas as pl
from jax.experimental.pallas import tpu as pltpu


def _round_up(x: int, m: int) -> int:
    return ((x + m - 1) // m) * m


def _sublane_min(dtype) -> int:
    itemsize = jnp.dtype(dtype).itemsize
    if itemsize >= 4:
        return 8
    if itemsize == 2:
        return 16
    return 32


def _largest_lane_tile(total: int, target: int) -> int:
    """Largest multiple of 128 that divides `total` (a multiple of 128) and is
    <= max(target, 128)."""
    t = max(128, min((max(target, 128) // 128) * 128, total))
    while total % t:
        t -= 128
    return t


def _vmem_budget_bytes() -> int:
    """Per-generation VMEM budget with ~30% headroom for Mosaic internals."""
    try:
        info = pltpu.get_tpu_info()
        cap = (getattr(info, "vmem_capacity_bytes", None)
               or getattr(info, "vmem_size_bytes", None))
        if cap:
            return int(cap * 0.7)
    except Exception:
        pass
    # Conservative fallback that fits v7x's 64 MiB physical VMEM.
    return 44 * 1024 * 1024


def ffn_kernel(x_ref, w1_ref, b1_ref, w2_ref, b2_ref, o_ref, acc_ref):
    # x_ref:  (TM, d_in_p)     row tile (resident across k)
    # w1_ref: (d_in_p, TK)     W1 column tile for this k step
    # b1_ref: (1, TK)          b1 slice
    # w2_ref: (TK, d_out_p)    W2 row tile
    # b2_ref: (1, d_out_p)
    # o_ref:  (TM, d_out_p)    output tile (resident across k)
    # acc_ref:(TM, d_out_p)    f32 accumulator scratch
    k = pl.program_id(1)

    # First matmul (MXU) with f32 accumulation; bias + ReLU on the VPU in f32.
    h = jnp.dot(x_ref[...], w1_ref[...], preferred_element_type=jnp.float32)
    h = jnp.maximum(h + b1_ref[...].astype(jnp.float32), 0.0)

    # Second matmul, accumulated in f32.
    update = jnp.dot(h.astype(w2_ref.dtype), w2_ref[...],
                     preferred_element_type=jnp.float32)

    @pl.when(k == 0)
    def _():
        acc_ref[...] = update          # no zero-fill + RMW on the first step

    @pl.when(k > 0)
    def _():
        acc_ref[...] += update

    @pl.when(k == pl.num_programs(1) - 1)
    def _():
        out = acc_ref[...] + b2_ref[...].astype(jnp.float32)
        o_ref[...] = out.astype(o_ref.dtype)


def prepare_params(w1, b1, w2, b2, *, tk=512, mxu_dtype=None):
    """Pad params once, out of the per-call hot path.

    w1: (d_in, d_ff)  (torch layer1.weight.T), b1: (d_ff,)
    w2: (d_ff, d_out) (torch layer2.weight.T), b2: (d_out,)
    d_ff is padded up to a multiple of the target TK so the kernel never has
    to shrink TK for divisibility.  mxu_dtype=jnp.bfloat16 enables the bf16
    MXU fast path (weights cast here, x cast per call); biases stay in their
    original dtype and are applied in f32.
    """
    d_in, d_ff = w1.shape
    assert w2.shape[0] == d_ff
    d_out = w2.shape[1]

    d_in_p = _round_up(d_in, 128)
    d_out_p = _round_up(d_out, 128)
    tk_pad = min(_round_up(max(tk, 128), 128), _round_up(d_ff, 128))
    d_ff_p = _round_up(d_ff, tk_pad)

    if mxu_dtype is not None:
        w1 = w1.astype(mxu_dtype)
        w2 = w2.astype(mxu_dtype)

    w1p = jnp.pad(w1, ((0, d_in_p - d_in), (0, d_ff_p - d_ff)))
    w2p = jnp.pad(w2, ((0, d_ff_p - d_ff), (0, d_out_p - d_out)))
    b1p = jnp.pad(b1, (0, d_ff_p - d_ff)).reshape(1, d_ff_p)
    b2p = jnp.pad(b2, (0, d_out_p - d_out)).reshape(1, d_out_p)
    return {"w1": w1p, "b1": b1p, "w2": w2p, "b2": b2p}


def feed_forward(x, params, *, d_out, tm=512, tk=512):
    """relu(x @ W1 + b1) @ W2 + b2 with pre-padded params (see prepare_params)."""
    w1p, b1p, w2p, b2p = params["w1"], params["b1"], params["w2"], params["b2"]
    d_in = x.shape[-1]
    d_in_p, d_ff_p = w1p.shape
    d_out_p = w2p.shape[1]
    out_dtype = x.dtype

    lead = x.shape[:-1]
    rows = math.prod(lead) if lead else 1
    x2 = x.reshape(rows, d_in)
    if x2.dtype != w1p.dtype:
        x2 = x2.astype(w1p.dtype)                 # bf16 MXU fast path
    if d_in_p != d_in:
        x2 = jnp.pad(x2, ((0, 0), (0, d_in_p - d_in)))

    ix = jnp.dtype(x2.dtype).itemsize
    iw = jnp.dtype(w1p.dtype).itemsize
    ib = jnp.dtype(b1p.dtype).itemsize

    # ---- tile selection under an explicit per-generation VMEM budget --------
    sub = _sublane_min(x2.dtype)                  # dtype-aware min row tile
    tm_eff = max(sub, min(_round_up(tm, sub), _round_up(rows, sub)))
    tk_eff = _largest_lane_tile(d_ff_p, tk)

    def tile_bytes(tm_e, tk_e):
        # Pallas double-buffers every BlockSpec operand; acc scratch is single.
        return (2 * (ix * tm_e * d_in_p          # x row tile
                     + iw * d_in_p * tk_e        # W1 column tile
                     + ib * tk_e                 # b1 slice
                     + iw * tk_e * d_out_p       # W2 row tile
                     + ib * d_out_p              # b2
                     + ix * tm_e * d_out_p)      # output tile
                + 4 * tm_e * d_out_p)            # f32 accumulator

    budget = _vmem_budget_bytes()
    while tile_bytes(tm_eff, tk_eff) > budget and tk_eff > 128:
        tk_eff = _largest_lane_tile(d_ff_p, tk_eff // 2)
    while tile_bytes(tm_eff, tk_eff) > budget and tm_eff > sub:
        tm_eff = max(sub, _round_up(tm_eff // 2, sub))

    # Give both v7x TensorCores work when there would be a single row tile.
    if pl.cdiv(rows, tm_eff) == 1 and rows >= 2 * sub:
        tm_eff = _round_up((rows + 1) // 2, sub)

    rows_p = _round_up(rows, tm_eff)
    if rows_p != rows:
        x2 = jnp.pad(x2, ((0, rows_p - rows), (0, 0)))

    grid = (rows_p // tm_eff, d_ff_p // tk_eff)
    n_row_tiles = grid[0]

    cost = pl.CostEstimate(
        flops=2 * rows_p * d_in_p * d_ff_p + 2 * rows_p * d_ff_p * d_out_p,
        transcendentals=0,
        bytes_accessed=(ix * rows_p * d_in_p
                        # weights are re-streamed once per row tile
                        + n_row_tiles * iw * (d_in_p * d_ff_p + d_ff_p * d_out_p)
                        + ib * (d_ff_p + d_out_p)
                        + ix * rows_p * d_out_p),
    )

    out = pl.pallas_call(
        ffn_kernel,
        out_shape=jax.ShapeDtypeStruct((rows_p, d_out_p), out_dtype),
        grid_spec=pltpu.PrefetchScalarGridSpec(
            num_scalar_prefetch=0,
            grid=grid,
            in_specs=[
                pl.BlockSpec((tm_eff, d_in_p), lambda i, k: (i, 0)),   # x rows
                pl.BlockSpec((d_in_p, tk_eff), lambda i, k: (0, k)),   # W1 tile
                pl.BlockSpec((1, tk_eff), lambda i, k: (0, k)),        # b1 slice
                pl.BlockSpec((tk_eff, d_out_p), lambda i, k: (k, 0)),  # W2 tile
                pl.BlockSpec((1, d_out_p), lambda i, k: (0, 0)),       # b2
            ],
            out_specs=pl.BlockSpec((tm_eff, d_out_p), lambda i, k: (i, 0)),
            scratch_shapes=[pltpu.VMEM((tm_eff, d_out_p), jnp.float32)],
        ),
        compiler_params=pltpu.CompilerParams(
            dimension_semantics=("parallel", "arbitrary"),
            vmem_limit_bytes=budget),
        cost_estimate=cost,
    )(x2, w1p, b1p, w2p, b2p)

    out = out[:rows, :d_out]
    return out.reshape(*lead, d_out)


def init_params(key, d_in, d_ff, d_out, dtype=jnp.float32):
    """Deterministic init mimicking torch.nn.Linear (uniform +/- 1/sqrt(fan_in)).

    Weights are stored transposed vs. torch (torch weight is (out, in))."""
    k1, k2, k3, k4 = jax.random.split(key, 4)
    bound1 = 1.0 / (d_in ** 0.5)
    bound2 = 1.0 / (d_ff ** 0.5)
    w1 = jax.random.uniform(k1, (d_in, d_ff), dtype, -bound1, bound1)
    b1 = jax.random.uniform(k2, (d_ff,), dtype, -bound1, bound1)
    w2 = jax.random.uniform(k3, (d_ff, d_out), dtype, -bound2, bound2)
    b2 = jax.random.uniform(k4, (d_out,), dtype, -bound2, bound2)
    return w1, b1, w2, b2


if __name__ == "__main__":
    key = jax.random.PRNGKey(0)
    B, S = 2, 8
    d_in, d_ff, d_out = 32, 64, 32

    kx, kp = jax.random.split(key)
    x = jax.random.normal(kx, (B, S, d_in), jnp.float32)
    w1, b1, w2, b2 = init_params(kp, d_in, d_ff, d_out)

    # Pad weights once (out of the per-call hot path).  For the bf16 MXU fast
    # path on v6e/v7x pass mxu_dtype=jnp.bfloat16 here (looser tolerance).
    params = prepare_params(w1, b1, w2, b2, tk=512)

    ffn = jax.jit(functools.partial(feed_forward, d_out=d_out, tm=512, tk=512))
    y = jax.block_until_ready(ffn(x, params))

    # Reference check in plain JAX.
    ref = jnp.maximum(x @ w1 + b1, 0.0) @ w2 + b2
    assert y.shape == (B, S, d_out)
    assert jnp.allclose(y, ref, atol=1e-5, rtol=1e-5)

    print("KERNEL_OK")
</pallas_src>

<mosaic_0001>
module attributes {stable_mosaic.version = 11 : i64} {
  func.func @ffn_kernel(%arg0: i32, %arg1: i32, %arg2: memref<8x128xf32, #tpu.memory_space<vmem>>, %arg3: memref<128x128xf32, #tpu.memory_space<vmem>>, %arg4: memref<1x128xf32, #tpu.memory_space<vmem>>, %arg5: memref<128x128xf32, #tpu.memory_space<vmem>>, %arg6: memref<1x128xf32, #tpu.memory_space<vmem>>, %arg7: memref<8x128xf32, #tpu.memory_space<vmem>>, %arg8: memref<8x128xf32, #tpu.memory_space<vmem>>) attributes {dimension_semantics = [#tpu.dimension_semantics<parallel>, #tpu.dimension_semantics<arbitrary>], iteration_bounds = array<i64: 2, 1>, scalar_prefetch = 0 : i64, scratch_operands = 1 : i64, tpu.core_type = #tpu.core_type<tc>, window_params = [{transform_indices = @transform_0, window_bounds = array<i64: 8, 128>}, {transform_indices = @transform_1, window_bounds = array<i64: 128, 128>}, {transform_indices = @transform_2, window_bounds = array<i64: 1, 128>}, {transform_indices = @transform_3, window_bounds = array<i64: 128, 128>}, {pipeline_mode = #tpu.pipeline_mode<synchronous>, transform_indices = @transform_4, window_bounds = array<i64: 1, 128>}, {transform_indices = @transform_5, window_bounds = array<i64: 8, 128>}]} {
    %c0 = arith.constant 0 : index
    %c0_0 = arith.constant 0 : index
    %0 = vector.load %arg2[%c0, %c0_0] : memref<8x128xf32, #tpu.memory_space<vmem>>, vector<8x128xf32>
    %c0_1 = arith.constant 0 : index
    %c0_2 = arith.constant 0 : index
    %1 = vector.load %arg3[%c0_1, %c0_2] : memref<128x128xf32, #tpu.memory_space<vmem>>, vector<128x128xf32>
    %cst = arith.constant dense<0.000000e+00> : vector<8x128xf32>
    %2 = tpu.matmul %0, %1, %cst {dimension_numbers = #tpu.dot_dimension_numbers<[1], [0], [0], [1], [0, 0, 1, 1], [], []>} : vector<8x128xf32>, vector<128x128xf32>, vector<8x128xf32> -> vector<8x128xf32>
    %c0_3 = arith.constant 0 : index
    %c0_4 = arith.constant 0 : index
    %3 = vector.load %arg4[%c0_3, %c0_4] : memref<1x128xf32, #tpu.memory_space<vmem>>, vector<1x128xf32>
    %4 = vector.broadcast %3 : vector<1x128xf32> to vector<8x128xf32>
    %5 = arith.addf %2, %4 : vector<8x128xf32>
    %cst_5 = arith.constant 0.000000e+00 : f32
    %6 = vector.broadcast %cst_5 : f32 to vector<8x128xf32>
    %7 = arith.maximumf %5, %6 : vector<8x128xf32>
    %c0_6 = arith.constant 0 : index
    %c0_7 = arith.constant 0 : index
    %8 = vector.load %arg5[%c0_6, %c0_7] : memref<128x128xf32, #tpu.memory_space<vmem>>, vector<128x128xf32>
    %cst_8 = arith.constant dense<0.000000e+00> : vector<8x128xf32>
    %9 = tpu.matmul %7, %8, %cst_8 {dimension_numbers = #tpu.dot_dimension_numbers<[1], [0], [0], [1], [0, 0, 1, 1], [], []>} : vector<8x128xf32>, vector<128x128xf32>, vector<8x128xf32> -> vector<8x128xf32>
    %c0_i32 = arith.constant 0 : i32
    %10 = arith.cmpi eq, %arg1, %c0_i32 : i32
    %11 = arith.extui %10 : i1 to i32
    %c0_i32_9 = arith.constant 0 : i32
    %12 = arith.cmpi ne, %11, %c0_i32_9 : i32
    scf.if %12 {
      %c0_14 = arith.constant 0 : index
      %c0_15 = arith.constant 0 : index
      %19 = vector.load %arg8[%c0_14, %c0_15] : memref<8x128xf32, #tpu.memory_space<vmem>>, vector<8x128xf32>
      tpu.vector_store %arg8[%c0_14, %c0_15], %9 {strides = array<i32>} : memref<8x128xf32, #tpu.memory_space<vmem>>, vector<8x128xf32>,
    } else {
    }
    %c0_i32_10 = arith.constant 0 : i32
    %13 = arith.cmpi sgt, %arg1, %c0_i32_10 : i32
    %14 = arith.extui %13 : i1 to i32
    %c0_i32_11 = arith.constant 0 : i32
    %15 = arith.cmpi ne, %14, %c0_i32_11 : i32
    scf.if %15 {
      %c0_14 = arith.constant 0 : index
      %c0_15 = arith.constant 0 : index
      %19 = vector.load %arg8[%c0_14, %c0_15] : memref<8x128xf32, #tpu.memory_space<vmem>>, vector<8x128xf32>
      %20 = arith.addf %19, %9 : vector<8x128xf32>
      %c0_16 = arith.constant 0 : index
      %c0_17 = arith.constant 0 : index
      %21 = vector.load %arg8[%c0_16, %c0_17] : memref<8x128xf32, #tpu.memory_space<vmem>>, vector<8x128xf32>
      tpu.vector_store %arg8[%c0_16, %c0_17], %20 {strides = array<i32>} : memref<8x128xf32, #tpu.memory_space<vmem>>, vector<8x128xf32>,
    } else {
    }
    %c0_i32_12 = arith.constant 0 : i32
    %16 = arith.cmpi eq, %arg1, %c0_i32_12 : i32
    %17 = arith.extui %16 : i1 to i32
    %c0_i32_13 = arith.constant 0 : i32
    %18 = arith.cmpi ne, %17, %c0_i32_13 : i32
    scf.if %18 {
      %c0_14 = arith.constant 0 : index
      %c0_15 = arith.constant 0 : index
      %19 = vector.load %arg8[%c0_14, %c0_15] : memref<8x128xf32, #tpu.memory_space<vmem>>, vector<8x128xf32>
      %c0_16 = arith.constant 0 : index
      %c0_17 = arith.constant 0 : index
      %20 = vector.load %arg6[%c0_16, %c0_17] : memref<1x128xf32, #tpu.memory_space<vmem>>, vector<1x128xf32>
      %21 = vector.broadcast %20 : vector<1x128xf32> to vector<8x128xf32>
      %22 = arith.addf %19, %21 : vector<8x128xf32>
      %c0_18 = arith.constant 0 : index
      %c0_19 = arith.constant 0 : index
      %23 = vector.load %arg7[%c0_18, %c0_19] : memref<8x128xf32, #tpu.memory_space<vmem>>, vector<8x128xf32>
      tpu.vector_store %arg7[%c0_18, %c0_19], %22 {strides = array<i32>} : memref<8x128xf32, #tpu.memory_space<vmem>>, vector<8x128xf32>,
    } else {
    }
    return
  }
  func.func @transform_0(%arg0: i32, %arg1: i32) -> (i32, i32) {
    %c0_i32 = arith.constant 0 : i32
    %c0_i32_0 = arith.constant 0 : i32
    return %arg0, %c0_i32 : i32, i32
  }
  func.func @transform_1(%arg0: i32, %arg1: i32) -> (i32, i32) {
    %c0_i32 = arith.constant 0 : i32
    %c0_i32_0 = arith.constant 0 : i32
    return %c0_i32, %arg1 : i32, i32
  }
  func.func @transform_2(%arg0: i32, %arg1: i32) -> (i32, i32) {
    %c0_i32 = arith.constant 0 : i32
    %c0_i32_0 = arith.constant 0 : i32
    return %c0_i32, %arg1 : i32, i32
  }
  func.func @transform_3(%arg0: i32, %arg1: i32) -> (i32, i32) {
    %c0_i32 = arith.constant 0 : i32
    %c0_i32_0 = arith.constant 0 : i32
    return %arg1, %c0_i32 : i32, i32
  }
  func.func @transform_4(%arg0: i32, %arg1: i32) -> (i32, i32) {
    %c0_i32 = arith.constant 0 : i32
    %c0_i32_0 = arith.constant 0 : i32
    %c0_i32_1 = arith.constant 0 : i32
    return %c0_i32, %c0_i32_0 : i32, i32
  }
  func.func @transform_5(%arg0: i32, %arg1: i32) -> (i32, i32) {
    %c0_i32 = arith.constant 0 : i32
    %c0_i32_0 = arith.constant 0 : i32
    return %arg0, %c0_i32 : i32, i32
  }
}

</mosaic_0001>

<bundles_post_ra>
// kernel: feed_forward.1
= control target key start
LH: loop header
LB: loop body
LE: loop exit
PB: predicated region body
PF: predicated region fallthrough
CT: control target
= control target key end

     0   :  { %10 = vsyncpa [#allocation4], 0  ;;  %s1083_s0 = inlined_call_operand.vmem [shape: f32[16,128], index: 0, kind: input, shape index: {}]   ;;  %s1084_s1 = inlined_call_operand.hbm [shape: f32[128,128], index: 1, kind: input, shape index: {}]   ;;  %s1085_s2 = inlined_call_operand.vmem [shape: f32[1,128], index: 2, kind: input, shape index: {}]   ;;  %s1086_s3 = inlined_call_operand.hbm [shape: f32[128,128], index: 3, kind: input, shape index: {}]   ;;  %s1087_s4 = inlined_call_operand.vmem [shape: f32[1,128], index: 4, kind: input, shape index: {}]   ;;  %s1088_s5 = inlined_call_operand.vmem [shape: f32[16,128], index: 5, kind: output, shape index: {}]  }
   0x1   :  { %11 = vsyncpa [#allocation6], 0  ;;  %s941_s18 = smov 0   ;;  %s943_s19 = smov 0  }
   0x2   :  { %s945_s20 = smov 0  }
   0x3 LB: > { %s598_s21 = sadd.s32 4294967295, %s902_s20   ;;  %s29_s22 = sadd.s32 1, %s898_s19  ;;  %s902_s20 = sphi %s945_s20, %s17_s20   ;;  %s898_s19 = sphi %s943_s19, %s1098_s19   ;;  %s894_s18 = sphi %s941_s18, %s1097_s18  }
   0x4   : > { %p31_p0 = scmp.ge.s32.totalorder %s29_s22, 2  ;;  %p600_p1 = scmp.ge.s32.totalorder %s902_s20, 1 }
   0x5   : > { %p185_p2 = scmp.lt.s32.totalorder %s902_s20, 3  ;;  %p966_p4 = scmp.eq.s32.totalorder %s598_s21, 0 }
   0x6   : > { %s1100_s22 = smov (%p31_p0, %s29_s22), 0  ;;  %s904_s25 = smov [#allocation3]  }
   0x7   : > { %p962_p3 = pnand %p600_p1, %p185_p2  ;;  %s199_s26 = sshll.u32 %s904_s25, 4  ;;  %s200_s26 = int_to_ptr.vmem [resolvable:$true] %s199_s26 }
   0x8   : > { %s1093_s24 = scalar_select %p966_p4, 1, 0 }
   0x9   : > { %s1092_s23 = scalar_select %p962_p3, 1, 0 }
   0xa   : > { %p774_p5 = pneg %p962_p3  ;;  %s905_s28 = smov [#allocation5]  }
   0xb   : > { %s221_s29 = sshll.u32 %s905_s28, 4  ;;  %s816_s7 = scalar_lea.hbm %s1084_s1, 2048  ;;  %s978_s29 = int_to_ptr.vmem [resolvable:$true] %s221_s29 }
   0xc   : > { %p974_p6 = pnand %p966_p4, %p774_p5  ;;  %p817_p7 = scmp.ne.s32.totalorder %s1084_s1, %s816_s7 }
   0xd   : > { %p823_p11 = scmp.lt.u32.totalorder %s816_s7, %s1084_s1 }
   0xe   : > { %p818_p8 = pneg %p974_p6 }
  0x10   : > { %p819_p9 = pnand %p818_p8, %p817_p7 }
  0x12   : > { %p820_p10 = pneg %p819_p9 }
  0x14   : > { %p825_p12 = pnand %p823_p11, %p820_p10 }
  0x16   : > { %828 = shalt.err (!%p825_p12)
}
  0x17   : > { %s829_s12 = scalar_lea.vmem %s200_s26, 2048  ;;  %p837_p2 = scmp.lt.s32.totalorder %s200_s26, %s200_s26 }
  0x18   : > { %p830_p13 = scmp.ne.s32.totalorder %s200_s26, %s829_s12  ;;  %p838_p5 = scmp.lt.s32.totalorder %s829_s12, %s829_s12 }
  0x1a   : > { %p832_p0 = pnand %p830_p13, %p818_p8  ;;  %p839_p4 = por %p838_p5, %p837_p2 }
  0x1c   : > { %p833_p1 = pneg %p832_p0 }
  0x1e   : > { %p840_p3 = pnand %p839_p4, %p833_p1 }
  0x20   : > { %843 = shalt.err (!%p840_p3)
}
  0x21   : > { %s906_s13 = smov 128   ;;  %s907_s14 = smov 8  }
  0x22   : > { %777 = dma.hbm_to_vmem [thread:$0]  (!%p974_p6), %s1084_s1, 2048, %s200_s26, [#allocation4], %s906_s13, %s906_s13, %s907_s14  }
  0x23   : > { %s844_s25 = scalar_lea.hbm %s1086_s3, 2048 }
  0x24   : > { %p845_p7 = scmp.ne.s32.totalorder %s1086_s3, %s844_s25  ;;  %p851_p9 = scmp.lt.u32.totalorder %s844_s25, %s1086_s3 }
  0x26   : > { %p847_p3 = pnand %p845_p7, %p818_p8 }
  0x28   : > { %p848_p4 = pneg %p847_p3 }
  0x2a   : > { %p853_p10 = pnand %p851_p9, %p848_p4 }
  0x2c   : > { %856 = shalt.err (!%p853_p10)
}
  0x2d   : > { %s857_s26 = scalar_lea.vmem %s978_s29, 2048  ;;  %p865_p0 = scmp.lt.s32.totalorder %s978_s29, %s978_s29 }
  0x2e   : > { %p858_p11 = scmp.ne.s32.totalorder %s978_s29, %s857_s26  ;;  %p866_p1 = scmp.lt.s32.totalorder %s857_s26, %s857_s26 }
  0x30   : > { %p860_p12 = pnand %p858_p11, %p818_p8  ;;  %p867_p2 = por %p866_p1, %p865_p0 }
  0x32   : > { %p861_p13 = pneg %p860_p12 }
  0x34   : > { %p868_p5 = pnand %p867_p2, %p861_p13 }
  0x36   : > { %871 = shalt.err (!%p868_p5)
}
  0x37   : > { %780 = dma.hbm_to_vmem [thread:$0]  (!%p974_p6), %s1086_s3, 2048, %s978_s29, [#allocation6], %s906_s13, %s906_s13, %s907_s14  }
  0x38   : > { %p1095_p7 = scmp.ne.s32.totalorder %s1092_s23, 0 }
  0x39   : > { %p1096_p3 = scmp.ne.s32.totalorder (!%p1095_p7), %s1093_s24, 0 }
  0x3a   : > { %247 = sbr.rel (%p1095_p7) target bundleno = 534 (0x216), region = 40 }
  0x41   : > { %885 = dma.done.wait (%p1096_p3), [#allocation4], 2048  }
  0x42   : > { %887 = vsyncadd (%p1096_p3), [#allocation4], 4294965248 }
  0x43   : > { %889 = dma.done.wait (%p1096_p3), [#allocation6], 2048  }
  0x44   : > { %891 = vsyncadd (%p1096_p3), [#allocation6], 4294965248  ;;  %v908_v0 = vmov 0.0|0.0   ;;  %vm909_vm0 = vmmov 0   ;;  %v910_v1 = vmov 0.0   ;;  %v293_v2 = vld [vmem:[#allocation3] sm:$0xff] }
  0x45   : > { %718 = vmatprep.subr.bf16.mxu0 %v908_v0  ;;  %680 = vmatprep.mubr.msk.f32.mxu0 %vm909_vm0, %v910_v1  ;;  %v294_v3 = vld [vmem:[#allocation3 + $0x8] sm:$0xff]  ;;  %v295_v4 = vld [vmem:[#allocation3 + $0x10] sm:$0xff]  ;;  %v296_v6 = vld [vmem:[#allocation3 + $0x18] sm:$0xff]  ;;  %p280_p6 = scmp.lt.s32.totalorder %s894_s18, 1 }
  0x46   : > { %742 = vmatprep.subr.bf16.mxu1 %v908_v0  ;;  %715 = vmatprep.mubr.msk.f32.mxu1 %vm909_vm0, %v910_v1  ;;  %v719_v5 = vpack.c.bf16 %v294_v3, %v293_v2  ;;  %v722_v7 = vpack.c.bf16 %v296_v6, %v295_v4  ;;  %v297_v8 = vld [vmem:[#allocation3 + $0x20] sm:$0xff]  ;;  %v298_v9 = vld [vmem:[#allocation3 + $0x28] sm:$0xff]  ;;  %v389_v12 = vld [vmem:[#allocation5 + $0x10] sm:$0xff] }
  0x47   : > { %v387_v10 = vld [vmem:[#allocation5] sm:$0xff]  ;;  %v388_v11 = vld [vmem:[#allocation5 + $0x8] sm:$0xff]  ;;  %v390_v13 = vld [vmem:[#allocation5 + $0x18] sm:$0xff]  ;;  %v725_v14 = vpack.c.bf16 %v298_v9, %v297_v8  ;;  %s1102_s18 = smov (!%p280_p6, %s894_s18), 1 }
  0x48   : > { %720 = vmatpush3.bf16.msra.mxu0 %v719_v5  ;;  %v743_v15 = vpack.c.bf16 %v388_v11, %v387_v10  ;;  %v299_v16 = vld [vmem:[#allocation3 + $0x30] sm:$0xff]  ;;  %v300_v17 = vld [vmem:[#allocation3 + $0x38] sm:$0xff]  ;;  %v746_v18 = vpack.c.bf16 %v390_v13, %v389_v12  ;;  %v391_v19 = vld [vmem:[#allocation5 + $0x20] sm:$0xff]  ;;  %s608_s23 = sshll.u32 %s1102_s18, 3 }
  0x49   : > { %721 = vmatprep.subr.bf16.mxu0 %v908_v0  ;;  %v392_v20 = vld [vmem:[#allocation5 + $0x28] sm:$0xff]  ;;  %v728_v21 = vpack.c.bf16 %v300_v17, %v299_v16  ;;  %v301_v22 = vld [vmem:[#allocation3 + $0x40] sm:$0xff]  ;;  %v393_v25 = vld [vmem:[#allocation5 + $0x30] sm:$0xff]  ;;  %s283_s29 = scalar_lea.vmem %s1083_s0, %s608_s23  ;;  %s291_s16 = scalar_lea.vmem %s1088_s5, %s608_s23 }
  0x4a   : > { %744 = vmatpush3.bf16.msra.mxu1 %v743_v15  ;;  %v302_v23 = vld [vmem:[#allocation3 + $0x48] sm:$0xff]  ;;  %v749_v24 = vpack.c.bf16 %v392_v20, %v391_v19  ;;  %v394_v26 = vld [vmem:[#allocation5 + $0x38] sm:$0xff]  ;;  %v303_v28 = vld [vmem:[#allocation3 + $0x50] sm:$0xff] }
  0x4b   : > { %745 = vmatprep.subr.bf16.mxu1 %v908_v0  ;;  %v731_v27 = vpack.c.bf16 %v302_v23, %v301_v22  ;;  %v304_v29 = vld [vmem:[#allocation3 + $0x58] sm:$0xff]  ;;  %v752_v30 = vpack.c.bf16 %v394_v26, %v393_v25  ;;  %v395_v31 = vld [vmem:[#allocation5 + $0x40] sm:$0xff]  ;;  %v396_v32 = vld [vmem:[#allocation5 + $0x48] sm:$0xff] }
  0x4c   : > { %723 = vmatpush3.bf16.msra.mxu0 %v722_v7  ;;  %v734_v33 = vpack.c.bf16 %v304_v29, %v303_v28  ;;  %v305_v34 = vld [vmem:[#allocation3 + $0x60] sm:$0xff]  ;;  %v306_v35 = vld [vmem:[#allocation3 + $0x68] sm:$0xff]  ;;  %v755_v36 = vpack.c.bf16 %v396_v32, %v395_v31  ;;  %v397_v37 = vld [vmem:[#allocation5 + $0x50] sm:$0xff] }
  0x4d   : > { %724 = vmatprep.subr.bf16.mxu0 %v908_v0  ;;  %v398_v38 = vld [vmem:[#allocation5 + $0x58] sm:$0xff]  ;;  %v737_v39 = vpack.c.bf16 %v306_v35, %v305_v34  ;;  %v307_v40 = vld [vmem:[#allocation3 + $0x70] sm:$0xff]  ;;  %v399_v43 = vld [vmem:[#allocation5 + $0x60] sm:$0xff] }
  0x4e   : > { %747 = vmatpush3.bf16.msra.mxu1 %v746_v18  ;;  %v308_v41 = vld [vmem:[#allocation3 + $0x78] sm:$0xff]  ;;  %v758_v42 = vpack.c.bf16 %v398_v38, %v397_v37  ;;  %v400_v44 = vld [vmem:[#allocation5 + $0x68] sm:$0xff]  ;;  %v292_v47 = vld [vmem:[%s283_s29] sm:$0xff] }
  0x4f   : > { %748 = vmatprep.subr.bf16.mxu1 %v908_v0  ;;  %v740_v45 = vpack.c.bf16 %v308_v41, %v307_v40  ;;  %v761_v46 = vpack.c.bf16 %v400_v44, %v399_v43  ;;  %v401_v48 = vld [vmem:[#allocation5 + $0x70] sm:$0xff]  ;;  %v402_v49 = vld [vmem:[#allocation5 + $0x78] sm:$0xff]  ;;  %v610_v51 = vld [vmem:[%s1085_s2] ss:$0 sm:$0xff] }
  0x50   : > { %726 = vmatpush3.bf16.msra.mxu0 %v725_v14  ;;  %v764_v50 = vpack.c.bf16 %v402_v49, %v401_v48  ;;  %v611_v56 = vld [vmem:[%s1087_s4] ss:$0 sm:$0xff] }
  0x51   : > { %727 = vmatprep.subr.bf16.mxu0 %v908_v0 }
  0x52   : > { %750 = vmatpush3.bf16.msra.mxu1 %v749_v24 }
  0x53   : > { %751 = vmatprep.subr.bf16.mxu1 %v908_v0 }
  0x54   : > { %729 = vmatpush3.bf16.msra.mxu0 %v728_v21 }
  0x55   : > { %730 = vmatprep.subr.bf16.mxu0 %v908_v0 }
  0x56   : > { %753 = vmatpush3.bf16.msra.mxu1 %v752_v30 }
  0x57   : > { %754 = vmatprep.subr.bf16.mxu1 %v908_v0 }
  0x58   : > { %732 = vmatpush3.bf16.msra.mxu0 %v731_v27 }
  0x59   : > { %733 = vmatprep.subr.bf16.mxu0 %v908_v0 }
  0x5a   : > { %756 = vmatpush3.bf16.msra.mxu1 %v755_v36 }
  0x5b   : > { %757 = vmatprep.subr.bf16.mxu1 %v908_v0 }
  0x5c   : > { %735 = vmatpush3.bf16.msra.mxu0 %v734_v33 }
  0x5d   : > { %736 = vmatprep.subr.bf16.mxu0 %v908_v0 }
  0x5e   : > { %759 = vmatpush3.bf16.msra.mxu1 %v758_v42 }
  0x5f   : > { %760 = vmatprep.subr.bf16.mxu1 %v908_v0 }
  0x60   : > { %738 = vmatpush3.bf16.msra.mxu0 %v737_v39 }
  0x61   : > { %739 = vmatprep.subr.bf16.mxu0 %v908_v0 }
  0x62   : > { %762 = vmatpush3.bf16.msra.mxu1 %v761_v46 }
  0x63   : > { %763 = vmatprep.subr.bf16.mxu1 %v908_v0 }
  0x64   : > { %741 = vmatpush3.bf16.msra.mxu0 %v740_v45 }
  0x66   : > { %765 = vmatpush3.bf16.msra.mxu1 %v764_v50 }
  0x67   : > { %681 = vmatmul.mubr.f32.vlgmr.msra.gmra.mrb[0].mxu0 %v292_v47 }
 0x13a   : > { %v382_v52 = vpop.f32.mrb[0].mxu0 }
 0x13b   : > { %v383_v53 = vadd.f32 %v610_v51, %v382_v52  ;;  %v682_v54 = vpop.f32.mrb[1].mxu0 }
 0x13d   : > { %v386_v55 = vmax.f32 %v383_v53, 0.0 }
 0x13f   : > { %716 = vmatmul.mubr.f32.vlgmr.msra.gmra.mrb[0].mxu1 %v386_v55 }
 0x212   : > { %v469_v57 = vpop.f32.mrb[0].mxu1 }
 0x213   : > { %v496_v58 = vadd.f32 %v611_v56, %v469_v57  ;;  %v717_v59 = vpop.f32.mrb[1].mxu1 }
 0x215   : > { %497 = vst [vmem:[%s291_s16] sm:$0xff] %v496_v58 }
 0x216 PF: > { %s17_s20 = sadd.s32 1, %s902_s20   ;;  %s1097_s18 = smov %s898_s19 }
 0x217   : > { %p14_p8 = scmp.ge.s32.totalorder %s17_s20, 4   ;;  %s1098_s19 = smov %s1100_s22 }
 0x219   :  { %16 = sbr.rel (!%p14_p8) target bundleno = 3 (0x3), region = 96 }
 0x220   :  { %517 = vsyncpa [#allocation4], 1 }
 0x221   :  { %519 = vsyncpa [#allocation4 + $0x1], 1 }
 0x222   :  { %520 = vsyncpa [#allocation6], 1 }

</bundles_post_ra>
